<compile_context>
chip_gen: v7x
topology: tpu7x:2x2x1
jax: 0.10.0
libtpu: 0.0.40
codegen_flags: <defaults>
</compile_context>

<pallas_src>
import jax
import jax.numpy as jnp
from jax.experimental import pallas as pl
from jax.experimental.pallas import tpu as pltpu

# Problem sizes (CartPole-like env: obs dim 4, 2 actions), hidden = 10.
N_STATES = 4
HIDDEN = 10
N_ACTIONS = 2

# TPU-friendly padded sizes (transposed layout: features on sublanes, batch on lanes).
S_PAD = 8            # padded input-feature rows; row ONE_ROW carries the bias-fold 1s
H_PAD = 16           # padded hidden rows
A_PAD = 8            # padded action rows (only first N_ACTIONS meaningful)
LANE = 128           # batch is padded to a multiple of 128 lanes -> unmasked stores
ONE_ROW = N_STATES   # constant-1 feature row used to fold fc1's bias into W1_p


def _mlp_kernel(x_ref, w1_ref, w2_ref, b2_ref, o_ref):
    # Transposed layout: batch lives on the lane (last) axis.
    #   hT = relu(W1_p @ xT)     (fc1 bias folded into W1_p via the constant-1 input row)
    #   yT = W2_p @ hT + b2
    h = jnp.dot(w1_ref[...], x_ref[...], preferred_element_type=jnp.float32)
    h = jnp.maximum(h, 0.0).astype(jnp.bfloat16)
    y = jnp.dot(w2_ref[...], h, preferred_element_type=jnp.float32)
    o_ref[...] = y + b2_ref[...]          # b2 is (A_PAD, 1) f32, broadcasts over lanes


def pad_params(w1, b1, w2, b2):
    """One-time padding/transposition of parameters to the kernel layout.
    w1: (N_STATES, HIDDEN), b1: (HIDDEN,), w2: (HIDDEN, N_ACTIONS), b2: (N_ACTIONS,).
    Call once (e.g. at init / after each target-net sync) and reuse the result."""
    w1_p = jnp.zeros((H_PAD, S_PAD), jnp.float32)
    w1_p = w1_p.at[:HIDDEN, :N_STATES].set(w1.T)
    w1_p = w1_p.at[:HIDDEN, ONE_ROW].set(b1)          # fold fc1 bias (constant-1 feature)
    w2_p = jnp.zeros((A_PAD, H_PAD), jnp.float32)
    w2_p = w2_p.at[:N_ACTIONS, :HIDDEN].set(w2.T)
    b2_p = jnp.zeros((A_PAD, 1), jnp.float32)
    b2_p = b2_p.at[:N_ACTIONS, 0].set(b2)
    return w1_p.astype(jnp.bfloat16), w2_p.astype(jnp.bfloat16), b2_p


@jax.jit
def net_forward(x, w1_p, w2_p, b2_p):
    """x: (B, N_STATES) f32; padded params from pad_params().
    Returns (B, N_ACTIONS) f32. Works for any batch size B >= 1."""
    B = x.shape[0]
    b_pad = pl.cdiv(B, LANE) * LANE                   # static at trace time

    # Build xT (S_PAD, b_pad): features on sublanes, batch on lanes, bias row = 1.
    x_t = jnp.zeros((S_PAD, b_pad), jnp.bfloat16)
    x_t = x_t.at[ONE_ROW, :].set(1.0)
    x_t = x_t.at[:N_STATES, :B].set(x.T.astype(jnp.bfloat16))

    out_t = pl.pallas_call(
        _mlp_kernel,
        out_shape=jax.ShapeDtypeStruct((A_PAD, b_pad), jnp.float32),
        grid=(1,),                                    # single step: full-batch block
        in_specs=[
            pl.BlockSpec((S_PAD, b_pad), lambda i: (0, 0)),   # xT (full-batch block)
            pl.BlockSpec((H_PAD, S_PAD), lambda i: (0, 0)),   # W1_p (resident)
            pl.BlockSpec((A_PAD, H_PAD), lambda i: (0, 0)),   # W2_p (resident)
            pl.BlockSpec((A_PAD, 1), lambda i: (0, 0)),       # b2
        ],
        out_specs=pl.BlockSpec((A_PAD, b_pad), lambda i: (0, 0)),
        compiler_params=pltpu.CompilerParams(
            dimension_semantics=("arbitrary",)),      # keep single-core; kernel is us-scale
    )(x_t, w1_p, w2_p, b2_p)

    # Padded batch lanes / padded action rows are sliced off here (never argmax'd
    # over the padded axes inside the kernel).
    return out_t[:N_ACTIONS, :B].T


def init_params(key):
    """Deterministic init mirroring the PyTorch module:
    weights ~ N(0, 0.1); biases use Linear's default U(-1/sqrt(fan_in), +1/sqrt(fan_in))."""
    k1, k2, k3, k4 = jax.random.split(key, 4)
    w1 = 0.1 * jax.random.normal(k1, (N_STATES, HIDDEN), jnp.float32)   # fc1.weight.T
    b1 = jax.random.uniform(k2, (HIDDEN,), jnp.float32,
                            minval=-1.0 / jnp.sqrt(N_STATES),
                            maxval=1.0 / jnp.sqrt(N_STATES))
    w2 = 0.1 * jax.random.normal(k3, (HIDDEN, N_ACTIONS), jnp.float32)  # out.weight.T
    b2 = jax.random.uniform(k4, (N_ACTIONS,), jnp.float32,
                            minval=-1.0 / jnp.sqrt(HIDDEN),
                            maxval=1.0 / jnp.sqrt(HIDDEN))
    return w1, b1, w2, b2


if __name__ == "__main__":
    key = jax.random.PRNGKey(0)
    k_params, k_x1, k_x2 = jax.random.split(key, 3)
    w1, b1, w2, b2 = init_params(k_params)

    # Pad/transpose params once (hoisted out of the forward path).
    w1_p, w2_p, b2_p = pad_params(w1, b1, w2, b2)

    def ref_forward(x):
        return jnp.maximum(x @ w1 + b1, 0.0) @ w2 + b2

    # Small action-selection batch and a typical DQN training batch.
    for B, kx in ((2, k_x1), (32, k_x2)):
        x = jax.random.normal(kx, (B, N_STATES), jnp.float32)
        out = jax.block_until_ready(net_forward(x, w1_p, w2_p, b2_p))
        ref = ref_forward(x)
        assert out.shape == (B, N_ACTIONS)
        # bf16 MXU inputs -> compare against the f32 reference with bf16-level tolerance.
        assert jnp.allclose(out, ref, atol=3e-2, rtol=2e-2), f"mismatch vs reference (B={B})"

    print("KERNEL_OK")
</pallas_src>

<mosaic_0001>
module attributes {stable_mosaic.version = 11 : i64} {
  func.func @_mlp_kernel(%arg0: i32, %arg1: memref<8x128xbf16, #tpu.memory_space<vmem>>, %arg2: memref<16x8xbf16, #tpu.memory_space<vmem>>, %arg3: memref<8x16xbf16, #tpu.memory_space<vmem>>, %arg4: memref<8x1xf32, #tpu.memory_space<vmem>>, %arg5: memref<8x128xf32, #tpu.memory_space<vmem>>) attributes {dimension_semantics = [#tpu.dimension_semantics<arbitrary>], iteration_bounds = array<i64: 1>, scalar_prefetch = 0 : i64, scratch_operands = 0 : i64, tpu.core_type = #tpu.core_type<tc>, window_params = [{pipeline_mode = #tpu.pipeline_mode<synchronous>, transform_indices = @transform_0, window_bounds = array<i64: 8, 128>}, {pipeline_mode = #tpu.pipeline_mode<synchronous>, transform_indices = @transform_1, window_bounds = array<i64: 16, 8>}, {pipeline_mode = #tpu.pipeline_mode<synchronous>, transform_indices = @transform_2, window_bounds = array<i64: 8, 16>}, {pipeline_mode = #tpu.pipeline_mode<synchronous>, transform_indices = @transform_3, window_bounds = array<i64: 8, 1>}, {pipeline_mode = #tpu.pipeline_mode<synchronous>, transform_indices = @transform_4, window_bounds = array<i64: 8, 128>}]} {
    %c0 = arith.constant 0 : index
    %c0_0 = arith.constant 0 : index
    %0 = vector.load %arg2[%c0, %c0_0] : memref<16x8xbf16, #tpu.memory_space<vmem>>, vector<16x8xbf16>
    %c0_1 = arith.constant 0 : index
    %c0_2 = arith.constant 0 : index
    %1 = vector.load %arg1[%c0_1, %c0_2] : memref<8x128xbf16, #tpu.memory_space<vmem>>, vector<8x128xbf16>
    %cst = arith.constant dense<0.000000e+00> : vector<16x128xf32>
    %2 = tpu.matmul %0, %1, %cst {dimension_numbers = #tpu.dot_dimension_numbers<[1], [0], [0], [1], [0, 0, 1, 1], [], []>} : vector<16x8xbf16>, vector<8x128xbf16>, vector<16x128xf32> -> vector<16x128xf32>
    %cst_3 = arith.constant 0.000000e+00 : f32
    %3 = vector.broadcast %cst_3 : f32 to vector<16x128xf32>
    %4 = arith.maximumf %2, %3 : vector<16x128xf32>
    %5 = arith.truncf %4 : vector<16x128xf32> to vector<16x128xbf16>
    %c0_4 = arith.constant 0 : index
    %c0_5 = arith.constant 0 : index
    %6 = vector.load %arg3[%c0_4, %c0_5] : memref<8x16xbf16, #tpu.memory_space<vmem>>, vector<8x16xbf16>
    %cst_6 = arith.constant dense<0.000000e+00> : vector<8x128xf32>
    %7 = tpu.matmul %6, %5, %cst_6 {dimension_numbers = #tpu.dot_dimension_numbers<[1], [0], [0], [1], [0, 0, 1, 1], [], []>} : vector<8x16xbf16>, vector<16x128xbf16>, vector<8x128xf32> -> vector<8x128xf32>
    %c0_7 = arith.constant 0 : index
    %c0_8 = arith.constant 0 : index
    %8 = vector.load %arg4[%c0_7, %c0_8] : memref<8x1xf32, #tpu.memory_space<vmem>>, vector<8x1xf32>
    %9 = vector.broadcast %8 : vector<8x1xf32> to vector<8x128xf32>
    %10 = arith.addf %7, %9 : vector<8x128xf32>
    %c0_9 = arith.constant 0 : index
    %c0_10 = arith.constant 0 : index
    %11 = vector.load %arg5[%c0_9, %c0_10] : memref<8x128xf32, #tpu.memory_space<vmem>>, vector<8x128xf32>
    tpu.vector_store %arg5[%c0_9, %c0_10], %10 {strides = array<i32>} : memref<8x128xf32, #tpu.memory_space<vmem>>, vector<8x128xf32>,
    return
  }
  func.func @transform_0(%arg0: i32) -> (i32, i32) {
    %c0_i32 = arith.constant 0 : i32
    %c0_i32_0 = arith.constant 0 : i32
    %c0_i32_1 = arith.constant 0 : i32
    return %c0_i32, %c0_i32_0 : i32, i32
  }
  func.func @transform_1(%arg0: i32) -> (i32, i32) {
    %c0_i32 = arith.constant 0 : i32
    %c0_i32_0 = arith.constant 0 : i32
    %c0_i32_1 = arith.constant 0 : i32
    return %c0_i32, %c0_i32_0 : i32, i32
  }
  func.func @transform_2(%arg0: i32) -> (i32, i32) {
    %c0_i32 = arith.constant 0 : i32
    %c0_i32_0 = arith.constant 0 : i32
    %c0_i32_1 = arith.constant 0 : i32
    return %c0_i32, %c0_i32_0 : i32, i32
  }
  func.func @transform_3(%arg0: i32) -> (i32, i32) {
    %c0_i32 = arith.constant 0 : i32
    %c0_i32_0 = arith.constant 0 : i32
    %c0_i32_1 = arith.constant 0 : i32
    return %c0_i32, %c0_i32_0 : i32, i32
  }
  func.func @transform_4(%arg0: i32) -> (i32, i32) {
    %c0_i32 = arith.constant 0 : i32
    %c0_i32_0 = arith.constant 0 : i32
    %c0_i32_1 = arith.constant 0 : i32
    return %c0_i32, %c0_i32_0 : i32, i32
  }
}

</mosaic_0001>

<bundles_post_ra>
// kernel: net_forward.1
= control target key start
LH: loop header
LB: loop body
LE: loop exit
PB: predicated region body
PF: predicated region fallthrough
CT: control target
= control target key end

     0   :  { %vm30_vm0 = vcmask 1043456   ;;  %v158_v0 = vmov 0.0   ;;  %vm159_vm1 = vmmov 0   ;;  %vm26_vm2 = vcmask 64512   ;;  %s201_s0 = inlined_call_operand.vmem [shape: bf16[8,128], index: 0, kind: input, shape index: {}]   ;;  %s202_s1 = inlined_call_operand.vmem [shape: bf16[16,8], index: 1, kind: input, shape index: {}]   ;;  %s203_s3 = inlined_call_operand.vmem [shape: f32[8,1], index: 3, kind: input, shape index: {}]   ;;  %s204_s2 = inlined_call_operand.vmem [shape: bf16[8,16], index: 2, kind: input, shape index: {}]   ;;  %s205_s4 = inlined_call_operand.vmem [shape: f32[8,128], index: 4, kind: output, shape index: {}]  }
   0x1   :  { %141 = vmatprep.subr.bf16.mxu0 %v158_v0  ;;  %v20_v1 = vld [vmem:[%s201_s0] sm:$0xf]  ;;  %143 = vmatprep.mubr.msk.bf16.mxu0 %vm159_vm1, %v158_v0  ;;  %v160_v4 = vmov 0   ;;  %vm85_vm3 = vcmask 130048  }
   0x2   :  { %v32_v2 = vsel %vm30_vm0, %v20_v1, 0  ;;  %v157_v3 = vld [vmem:[%s202_s1] sm:$0xff]   ;;  %147 = vmatprep.subr.bf16.mxu1 %v158_v0  ;;  %149 = vmatprep.mubr.msk.bf16.mxu1 %vm159_vm1, %v158_v0 }
   0x3   :  { %142 = vmatpush3.bf16.msra.mxu0 %v32_v2  ;;  %156 = vset.pattern.permute.xlu0 %v160_v4  ;;  %v79_v5 = vld [vmem:[%s203_s3] sm:$0xff] }
   0x4   :  { %82 = vperm.xlu0 %156, %v79_v5   ;;  %v78_v13 = vld [vmem:[%s204_s2] sm:$0xf] }
   0x6   :  { %144 = vmatmul.mubr.msk.bf16.vlgmr.msra.gmra.mrb[0].mxu0 %vm26_vm2, %v157_v3 }
  0x83   :  { %v83_v14 = vpop.permute.xlu0 %82 }
  0xd9   :  { %v68_v6 = vpop.f32.mrb[0].mxu0 }
  0xda   :  { %v145_v7 = vpop.f32.mrb[1].mxu0  ;;  %v75_v9 = vmax.f32 %v68_v6, 0.0 }
  0xdb   :  { %v71_v8 = vpop.f32.mrb[2].mxu0 }
  0xdc   :  { %v76_v10 = vmax.f32 %v71_v8, 0.0  ;;  %v146_v11 = vpop.f32.mrb[3].mxu0 }
  0xde   :  { %v77_v12 = vpack.c.bf16 %v76_v10, %v75_v9 }
  0xe0   :  { %148 = vmatpush3.bf16.msra.mxu1 %v77_v12 }
  0xe3   :  { %150 = vmatmul.mubr.msk.bf16.vlgmr.msra.gmra.mrb[0].mxu1 %vm85_vm3, %v78_v13 }
 0x1b6   :  { %v123_v15 = vpop.f32.mrb[0].mxu1 }
 0x1b7   :  { %v124_v16 = vadd.f32 %v123_v15, %v83_v14  ;;  %v151_v17 = vpop.f32.mrb[1].mxu1 }
 0x1b8   :  { %v126_v18 = vpop.f32.mrb[2].mxu1 }
 0x1b9   :  { %129 = vst [vmem:[%s205_s4] sm:$0xff] %v124_v16  ;;  %v152_v19 = vpop.f32.mrb[3].mxu1 }

</bundles_post_ra>
